<compile_context>
chip_gen: v7x
topology: tpu7x:2x2x1
jax: 0.10.0
libtpu: 0.0.40
codegen_flags: <defaults>
</compile_context>

<pallas_src>
import numpy as np
import jax
import jax.numpy as jnp
from jax.experimental import pallas as pl
from jax.experimental.pallas import tpu as pltpu
from scipy.optimize import linear_sum_assignment

COEF_CLASS = 2.0
COEF_BBOX = 5.0
COEF_GIOU = 2.0
ALPHA = 0.25
GAMMA = 2.0   # == 2.0 -> focal pow is implemented as explicit squaring
EPS = 1e-8


def matcher_cost_kernel(logits_ref, pboxes_ref, onehot_ref, gboxes_t_ref, cost_ref):
    # logits_ref   : (TP, C)     raw logits (one row-tile of queries)
    # pboxes_ref   : (TP, 4)     cxcywh
    # onehot_ref   : (C, Gp)     COEF_CLASS * one_hot(gt_class), transposed
    # gboxes_t_ref : (4, Gp)     cxcywh, transposed (GT index on the lane axis)
    # cost_ref     : (TP, Gp)    output cost-matrix tile
    prob = jax.nn.sigmoid(logits_ref[...])                               # (TP, C)
    one_m = 1.0 - prob
    # GAMMA == 2.0: square explicitly; float-exponent pow would add exp+log
    # per element on the EUP (the saturated unit for this block).
    neg_cost = (1.0 - ALPHA) * (prob * prob) * (-jnp.log(one_m + EPS))
    pos_cost = ALPHA * (one_m * one_m) * (-jnp.log(prob + EPS))
    # cost_class gather by gt_class == (pos - neg) @ onehot^T  (MXU matmul).
    # COEF_CLASS is already folded into onehot_ref (exact: 0.0 / 2.0 entries).
    cost_class = jnp.dot(pos_cost - neg_cost, onehot_ref[...],
                         preferred_element_type=jnp.float32)             # (TP, Gp)

    pb = pboxes_ref[...]                                                 # (TP, 4)
    gb = gboxes_t_ref[...]                                               # (4, Gp)
    pcx, pcy, pw, ph = pb[:, 0:1], pb[:, 1:2], pb[:, 2:3], pb[:, 3:4]    # (TP, 1)
    gcx, gcy, gw, gh = gb[0:1, :], gb[1:2, :], gb[2:3, :], gb[3:4, :]    # (1, Gp)

    # L1 cdist (broadcast (TP,1) vs (1,Gp) -> (TP,Gp))
    cost_boxes = (jnp.abs(pcx - gcx) + jnp.abs(pcy - gcy)
                  + jnp.abs(pw - gw) + jnp.abs(ph - gh))

    # cxcywh -> xyxy
    px1, px2 = pcx - 0.5 * pw, pcx + 0.5 * pw
    py1, py2 = pcy - 0.5 * ph, pcy + 0.5 * ph
    gx1, gx2 = gcx - 0.5 * gw, gcx + 0.5 * gw
    gy1, gy2 = gcy - 0.5 * gh, gcy + 0.5 * gh

    area_p = (px2 - px1) * (py2 - py1)                                   # (TP, 1)
    area_g = (gx2 - gx1) * (gy2 - gy1)                                   # (1, Gp)

    iw = jnp.maximum(jnp.minimum(px2, gx2) - jnp.maximum(px1, gx1), 0.0)
    ih = jnp.maximum(jnp.minimum(py2, gy2) - jnp.maximum(py1, gy1), 0.0)
    inter = iw * ih
    union = area_p + area_g - inter
    iou = inter / union                                                  # exact divide

    ew = jnp.maximum(jnp.maximum(px2, gx2) - jnp.minimum(px1, gx1), 0.0)
    eh = jnp.maximum(jnp.maximum(py2, gy2) - jnp.minimum(py1, gy1), 0.0)
    area_enc = ew * eh

    # -giou == -(iou - (area_enc - union)/area_enc) == 1 - union/area_enc - iou
    cost_giou = 1.0 - union / area_enc - iou

    cost_ref[...] = (cost_class
                     + COEF_BBOX * cost_boxes
                     + COEF_GIOU * cost_giou)


def _round_up(x, m):
    return ((x + m - 1) // m) * m


def hungarian_cost(pred_logits, pred_boxes, gt_class, gt_boxes):
    """Pallas-computed cost matrix, sliced/reshaped to (bs, num_queries, G)."""
    bs, nq, num_classes = pred_logits.shape
    P = bs * nq
    G = gt_boxes.shape[0]

    # Lane-dense GT axis: pad G to a multiple of 128 (unmasked stores, clean
    # MXU N dim). Padded GT boxes get unit area so IoU/GIoU never hit 0/0.
    G_pad = _round_up(max(G, 1), 128)
    # Row tiling over P: tile of up to 512 queries, double-buffered by the
    # BlockSpec pipeline; "parallel" lets v7x split tiles across its 2 TCs.
    TILE_P = min(512, _round_up(P, 8))
    P_pad = _round_up(P, TILE_P)

    logits = pred_logits.reshape(P, num_classes).astype(jnp.float32)
    pboxes = pred_boxes.reshape(P, 4).astype(jnp.float32)
    if P_pad != P:
        logits = jnp.pad(logits, ((0, P_pad - P), (0, 0)))
        pboxes = jnp.pad(pboxes, ((0, P_pad - P), (0, 0)))

    gcls = gt_class.astype(jnp.int32)
    gbox = gt_boxes.astype(jnp.float32)
    if G_pad != G:
        gcls = jnp.pad(gcls, (0, G_pad - G))
        pad_box = jnp.tile(jnp.array([[0.5, 0.5, 1.0, 1.0]], jnp.float32),
                           (G_pad - G, 1))
        gbox = jnp.concatenate([gbox, pad_box], axis=0)

    # COEF_CLASS folded into the gather matrix (entries are exactly 0.0 / 2.0).
    # NOTE: keeping f32 operands so the cost matrix matches the reference math
    # to 1e-4; bf16 logits/onehot would halve the dominant DMA at ~1e-3 cost.
    onehot = (jax.nn.one_hot(gcls, num_classes, dtype=jnp.float32)
              * COEF_CLASS).T                                            # (C, G_pad)
    gboxes_t = gbox.T                                                    # (4, G_pad)

    grid = (pl.cdiv(P_pad, TILE_P),)
    cost = pl.pallas_call(
        matcher_cost_kernel,
        out_shape=jax.ShapeDtypeStruct((P_pad, G_pad), jnp.float32),
        grid=grid,
        in_specs=[
            pl.BlockSpec((TILE_P, num_classes), lambda i: (i, 0)),   # logits tile
            pl.BlockSpec((TILE_P, 4), lambda i: (i, 0)),             # pred boxes tile
            pl.BlockSpec((num_classes, G_pad), lambda i: (0, 0)),    # onehot (resident)
            pl.BlockSpec((4, G_pad), lambda i: (0, 0)),              # gt boxes (resident)
        ],
        out_specs=pl.BlockSpec((TILE_P, G_pad), lambda i: (i, 0)),
        compiler_params=pltpu.CompilerParams(
            dimension_semantics=("parallel",)),
    )(logits, pboxes, onehot, gboxes_t)

    return cost[:P, :G].reshape(bs, nq, G)


def hungarian_matcher(pred_logits, pred_boxes, annotations):
    """Full forward: cost matrix on TPU (Pallas), assignment on host (scipy)."""
    gt_class = jnp.concatenate([a["labels"] for a in annotations])
    gt_boxes = jnp.concatenate([a["boxes"] for a in annotations])
    cost = hungarian_cost(pred_logits, pred_boxes, gt_class, gt_boxes)
    cost_np = np.asarray(jax.block_until_ready(cost))

    # TODO(synk): linear_sum_assignment (Hungarian algorithm) has no clean
    # Pallas equivalent; done on host, matching the PyTorch reference (.cpu()).
    # (The D2H transfer could be overlapped with per-image solves for large bs.)
    sizes = [int(a["boxes"].shape[0]) for a in annotations]
    indices = []
    offset = 0
    for i, s in enumerate(sizes):
        c = cost_np[i, :, offset:offset + s]
        row, col = linear_sum_assignment(c)
        indices.append((np.asarray(row, dtype=np.int64),
                        np.asarray(col, dtype=np.int64)))
        offset += s
    return indices, cost


def _reference_cost(pred_logits, pred_boxes, gt_class, gt_boxes):
    """Pure-jnp reference (mirrors the PyTorch math) for a self-check."""
    bs, nq, _ = pred_logits.shape
    prob = jax.nn.sigmoid(pred_logits.reshape(bs * nq, -1).astype(jnp.float32))
    pb = pred_boxes.reshape(bs * nq, 4).astype(jnp.float32)
    gb = gt_boxes.astype(jnp.float32)

    neg = (1 - ALPHA) * prob ** GAMMA * (-jnp.log(1 - prob + EPS))
    pos = ALPHA * (1 - prob) ** GAMMA * (-jnp.log(prob + EPS))
    cost_class = pos[:, gt_class] - neg[:, gt_class]

    cost_boxes = jnp.sum(jnp.abs(pb[:, None, :] - gb[None, :, :]), axis=-1)

    def to_xyxy(b):
        cx, cy, w, h = b[:, 0], b[:, 1], b[:, 2], b[:, 3]
        return jnp.stack([cx - w / 2, cy - h / 2, cx + w / 2, cy + h / 2], -1)

    p, g = to_xyxy(pb), to_xyxy(gb)
    ap = (p[:, 2] - p[:, 0]) * (p[:, 3] - p[:, 1])
    ag = (g[:, 2] - g[:, 0]) * (g[:, 3] - g[:, 1])
    lt = jnp.maximum(p[:, None, :2], g[None, :, :2])
    rb = jnp.minimum(p[:, None, 2:], g[None, :, 2:])
    wh = jnp.clip(rb - lt, 0)
    inter = wh[..., 0] * wh[..., 1]
    union = ap[:, None] + ag[None, :] - inter
    iou = inter / union
    lte = jnp.minimum(p[:, None, :2], g[None, :, :2])
    rbe = jnp.maximum(p[:, None, 2:], g[None, :, 2:])
    whe = jnp.clip(rbe - lte, 0)
    area_e = whe[..., 0] * whe[..., 1]
    giou = iou - (area_e - union) / area_e

    cost = COEF_BBOX * cost_boxes + COEF_CLASS * cost_class + COEF_GIOU * (-giou)
    return cost.reshape(bs, nq, -1)


if __name__ == "__main__":
    bs, num_queries, num_classes = 2, 8, 32
    sizes = [3, 5]  # GT boxes per image, total G = 8

    key = jax.random.PRNGKey(0)
    k1, k2, k3, k4, k5 = jax.random.split(key, 5)

    pred_logits = jax.random.normal(k1, (bs, num_queries, num_classes), jnp.float32)
    pred_cxcy = jax.random.uniform(k2, (bs, num_queries, 2), minval=0.2, maxval=0.8)
    pred_wh = jax.random.uniform(k3, (bs, num_queries, 2), minval=0.05, maxval=0.3)
    pred_boxes = jnp.concatenate([pred_cxcy, pred_wh], axis=-1)

    annotations = []
    kk = k4
    for i, s in enumerate(sizes):
        kk, ka, kb, kc = jax.random.split(kk, 4)
        labels = jax.random.randint(ka, (s,), 0, num_classes, dtype=jnp.int32)
        cxcy = jax.random.uniform(kb, (s, 2), minval=0.2, maxval=0.8)
        wh = jax.random.uniform(kc, (s, 2), minval=0.05, maxval=0.3)
        annotations.append({"labels": labels,
                            "boxes": jnp.concatenate([cxcy, wh], axis=-1)})

    indices, cost = hungarian_matcher(pred_logits, pred_boxes, annotations)
    jax.block_until_ready(cost)

    # Self-check of the Pallas-computed cost matrix against a pure-jnp reference.
    gt_class = jnp.concatenate([a["labels"] for a in annotations])
    gt_boxes = jnp.concatenate([a["boxes"] for a in annotations])
    ref = _reference_cost(pred_logits, pred_boxes, gt_class, gt_boxes)
    np.testing.assert_allclose(np.asarray(cost), np.asarray(ref),
                               rtol=1e-4, atol=1e-4)

    assert len(indices) == bs
    for (r, c), s in zip(indices, sizes):
        assert r.shape == (s,) and c.shape == (s,)

    print("KERNEL_OK")
</pallas_src>

<mosaic_0001>
module attributes {stable_mosaic.version = 11 : i64} {
  func.func @matcher_cost_kernel(%arg0: i32, %arg1: memref<16x32xf32, #tpu.memory_space<vmem>>, %arg2: memref<16x4xf32, #tpu.memory_space<vmem>>, %arg3: memref<32x128xf32, #tpu.memory_space<vmem>>, %arg4: memref<4x128xf32, #tpu.memory_space<vmem>>, %arg5: memref<16x128xf32, #tpu.memory_space<vmem>>) attributes {dimension_semantics = [#tpu.dimension_semantics<parallel>], iteration_bounds = array<i64: 1>, scalar_prefetch = 0 : i64, scratch_operands = 0 : i64, tpu.core_type = #tpu.core_type<tc>, window_params = [{transform_indices = @transform_0, window_bounds = array<i64: 16, 32>}, {transform_indices = @transform_1, window_bounds = array<i64: 16, 4>}, {pipeline_mode = #tpu.pipeline_mode<synchronous>, transform_indices = @transform_2, window_bounds = array<i64: 32, 128>}, {pipeline_mode = #tpu.pipeline_mode<synchronous>, transform_indices = @transform_3, window_bounds = array<i64: 4, 128>}, {transform_indices = @transform_4, window_bounds = array<i64: 16, 128>}]} {
    %c0 = arith.constant 0 : index
    %c0_0 = arith.constant 0 : index
    %0 = vector.load %arg1[%c0, %c0_0] : memref<16x32xf32, #tpu.memory_space<vmem>>, vector<16x32xf32>
    %1 = arith.negf %0 : vector<16x32xf32>
    %2 = math.exp %1 : vector<16x32xf32>
    %cst = arith.constant 1.000000e+00 : f32
    %3 = vector.broadcast %cst : f32 to vector<16x32xf32>
    %4 = arith.addf %3, %2 : vector<16x32xf32>
    %5 = arith.divf %3, %4 : vector<16x32xf32>
    %cst_1 = arith.constant 1.000000e+00 : f32
    %6 = vector.broadcast %cst_1 : f32 to vector<16x32xf32>
    %7 = arith.subf %6, %5 : vector<16x32xf32>
    %8 = arith.mulf %5, %5 : vector<16x32xf32>
    %cst_2 = arith.constant 7.500000e-01 : f32
    %9 = vector.broadcast %cst_2 : f32 to vector<16x32xf32>
    %10 = arith.mulf %9, %8 : vector<16x32xf32>
    %cst_3 = arith.constant 9.99999993E-9 : f32
    %11 = vector.broadcast %cst_3 : f32 to vector<16x32xf32>
    %12 = arith.addf %7, %11 : vector<16x32xf32>
    %13 = math.log %12 : vector<16x32xf32>
    %cst_4 = arith.constant 0.000000e+00 : f32
    %14 = vector.broadcast %cst_4 : f32 to vector<16x32xf32>
    %15 = arith.subf %14, %13 : vector<16x32xf32>
    %16 = arith.mulf %10, %15 : vector<16x32xf32>
    %17 = arith.mulf %7, %7 : vector<16x32xf32>
    %cst_5 = arith.constant 2.500000e-01 : f32
    %18 = vector.broadcast %cst_5 : f32 to vector<16x32xf32>
    %19 = arith.mulf %18, %17 : vector<16x32xf32>
    %cst_6 = arith.constant 9.99999993E-9 : f32
    %20 = vector.broadcast %cst_6 : f32 to vector<16x32xf32>
    %21 = arith.addf %5, %20 : vector<16x32xf32>
    %22 = math.log %21 : vector<16x32xf32>
    %cst_7 = arith.constant 0.000000e+00 : f32
    %23 = vector.broadcast %cst_7 : f32 to vector<16x32xf32>
    %24 = arith.subf %23, %22 : vector<16x32xf32>
    %25 = arith.mulf %19, %24 : vector<16x32xf32>
    %26 = arith.subf %25, %16 : vector<16x32xf32>
    %c0_8 = arith.constant 0 : index
    %c0_9 = arith.constant 0 : index
    %27 = vector.load %arg3[%c0_8, %c0_9] : memref<32x128xf32, #tpu.memory_space<vmem>>, vector<32x128xf32>
    %cst_10 = arith.constant dense<0.000000e+00> : vector<16x128xf32>
    %28 = tpu.matmul %26, %27, %cst_10 {dimension_numbers = #tpu.dot_dimension_numbers<[1], [0], [0], [1], [0, 0, 1, 1], [], []>} : vector<16x32xf32>, vector<32x128xf32>, vector<16x128xf32> -> vector<16x128xf32>
    %c0_11 = arith.constant 0 : index
    %c0_12 = arith.constant 0 : index
    %29 = vector.load %arg2[%c0_11, %c0_12] : memref<16x4xf32, #tpu.memory_space<vmem>>, vector<16x4xf32>
    %c0_13 = arith.constant 0 : index
    %c0_14 = arith.constant 0 : index
    %30 = vector.load %arg4[%c0_13, %c0_14] : memref<4x128xf32, #tpu.memory_space<vmem>>, vector<4x128xf32>
    %31 = vector.extract_strided_slice %29 {offsets = [0, 0], sizes = [16, 1], strides = [1, 1]} : vector<16x4xf32> to vector<16x1xf32>
    %32 = vector.extract_strided_slice %29 {offsets = [0, 1], sizes = [16, 1], strides = [1, 1]} : vector<16x4xf32> to vector<16x1xf32>
    %33 = vector.extract_strided_slice %29 {offsets = [0, 2], sizes = [16, 1], strides = [1, 1]} : vector<16x4xf32> to vector<16x1xf32>
    %34 = vector.extract_strided_slice %29 {offsets = [0, 3], sizes = [16, 1], strides = [1, 1]} : vector<16x4xf32> to vector<16x1xf32>
    %35 = vector.extract_strided_slice %30 {offsets = [0, 0], sizes = [1, 128], strides = [1, 1]} : vector<4x128xf32> to vector<1x128xf32>
    %36 = vector.extract_strided_slice %30 {offsets = [1, 0], sizes = [1, 128], strides = [1, 1]} : vector<4x128xf32> to vector<1x128xf32>
    %37 = vector.extract_strided_slice %30 {offsets = [2, 0], sizes = [1, 128], strides = [1, 1]} : vector<4x128xf32> to vector<1x128xf32>
    %38 = vector.extract_strided_slice %30 {offsets = [3, 0], sizes = [1, 128], strides = [1, 1]} : vector<4x128xf32> to vector<1x128xf32>
    %39 = vector.broadcast %31 : vector<16x1xf32> to vector<16x128xf32>
    %40 = vector.broadcast %35 : vector<1x128xf32> to vector<16x128xf32>
    %41 = arith.subf %39, %40 : vector<16x128xf32>
    %42 = math.absf %41 : vector<16x128xf32>
    %43 = vector.broadcast %32 : vector<16x1xf32> to vector<16x128xf32>
    %44 = vector.broadcast %36 : vector<1x128xf32> to vector<16x128xf32>
    %45 = arith.subf %43, %44 : vector<16x128xf32>
    %46 = math.absf %45 : vector<16x128xf32>
    %47 = arith.addf %42, %46 : vector<16x128xf32>
    %48 = vector.broadcast %33 : vector<16x1xf32> to vector<16x128xf32>
    %49 = vector.broadcast %37 : vector<1x128xf32> to vector<16x128xf32>
    %50 = arith.subf %48, %49 : vector<16x128xf32>
    %51 = math.absf %50 : vector<16x128xf32>
    %52 = arith.addf %47, %51 : vector<16x128xf32>
    %53 = vector.broadcast %34 : vector<16x1xf32> to vector<16x128xf32>
    %54 = vector.broadcast %38 : vector<1x128xf32> to vector<16x128xf32>
    %55 = arith.subf %53, %54 : vector<16x128xf32>
    %56 = math.absf %55 : vector<16x128xf32>
    %57 = arith.addf %52, %56 : vector<16x128xf32>
    %cst_15 = arith.constant 5.000000e-01 : f32
    %58 = vector.broadcast %cst_15 : f32 to vector<16x1xf32>
    %59 = arith.mulf %58, %33 : vector<16x1xf32>
    %60 = arith.subf %31, %59 : vector<16x1xf32>
    %cst_16 = arith.constant 5.000000e-01 : f32
    %61 = vector.broadcast %cst_16 : f32 to vector<16x1xf32>
    %62 = arith.mulf %61, %33 : vector<16x1xf32>
    %63 = arith.addf %31, %62 : vector<16x1xf32>
    %cst_17 = arith.constant 5.000000e-01 : f32
    %64 = vector.broadcast %cst_17 : f32 to vector<16x1xf32>
    %65 = arith.mulf %64, %34 : vector<16x1xf32>
    %66 = arith.subf %32, %65 : vector<16x1xf32>
    %cst_18 = arith.constant 5.000000e-01 : f32
    %67 = vector.broadcast %cst_18 : f32 to vector<16x1xf32>
    %68 = arith.mulf %67, %34 : vector<16x1xf32>
    %69 = arith.addf %32, %68 : vector<16x1xf32>
    %cst_19 = arith.constant 5.000000e-01 : f32
    %70 = vector.broadcast %cst_19 : f32 to vector<1x128xf32>
    %71 = arith.mulf %70, %37 : vector<1x128xf32>
    %72 = arith.subf %35, %71 : vector<1x128xf32>
    %cst_20 = arith.constant 5.000000e-01 : f32
    %73 = vector.broadcast %cst_20 : f32 to vector<1x128xf32>
    %74 = arith.mulf %73, %37 : vector<1x128xf32>
    %75 = arith.addf %35, %74 : vector<1x128xf32>
    %cst_21 = arith.constant 5.000000e-01 : f32
    %76 = vector.broadcast %cst_21 : f32 to vector<1x128xf32>
    %77 = arith.mulf %76, %38 : vector<1x128xf32>
    %78 = arith.subf %36, %77 : vector<1x128xf32>
    %cst_22 = arith.constant 5.000000e-01 : f32
    %79 = vector.broadcast %cst_22 : f32 to vector<1x128xf32>
    %80 = arith.mulf %79, %38 : vector<1x128xf32>
    %81 = arith.addf %36, %80 : vector<1x128xf32>
    %82 = arith.subf %63, %60 : vector<16x1xf32>
    %83 = arith.subf %69, %66 : vector<16x1xf32>
    %84 = arith.mulf %82, %83 : vector<16x1xf32>
    %85 = arith.subf %75, %72 : vector<1x128xf32>
    %86 = arith.subf %81, %78 : vector<1x128xf32>
    %87 = arith.mulf %85, %86 : vector<1x128xf32>
    %88 = vector.broadcast %63 : vector<16x1xf32> to vector<16x128xf32>
    %89 = vector.broadcast %75 : vector<1x128xf32> to vector<16x128xf32>
    %90 = arith.minimumf %88, %89 : vector<16x128xf32>
    %91 = vector.broadcast %60 : vector<16x1xf32> to vector<16x128xf32>
    %92 = vector.broadcast %72 : vector<1x128xf32> to vector<16x128xf32>
    %93 = arith.maximumf %91, %92 : vector<16x128xf32>
    %94 = arith.subf %90, %93 : vector<16x128xf32>
    %cst_23 = arith.constant 0.000000e+00 : f32
    %95 = vector.broadcast %cst_23 : f32 to vector<16x128xf32>
    %96 = arith.maximumf %94, %95 : vector<16x128xf32>
    %97 = vector.broadcast %69 : vector<16x1xf32> to vector<16x128xf32>
    %98 = vector.broadcast %81 : vector<1x128xf32> to vector<16x128xf32>
    %99 = arith.minimumf %97, %98 : vector<16x128xf32>
    %100 = vector.broadcast %66 : vector<16x1xf32> to vector<16x128xf32>
    %101 = vector.broadcast %78 : vector<1x128xf32> to vector<16x128xf32>
    %102 = arith.maximumf %100, %101 : vector<16x128xf32>
    %103 = arith.subf %99, %102 : vector<16x128xf32>
    %cst_24 = arith.constant 0.000000e+00 : f32
    %104 = vector.broadcast %cst_24 : f32 to vector<16x128xf32>
    %105 = arith.maximumf %103, %104 : vector<16x128xf32>
    %106 = arith.mulf %96, %105 : vector<16x128xf32>
    %107 = vector.broadcast %84 : vector<16x1xf32> to vector<16x128xf32>
    %108 = vector.broadcast %87 : vector<1x128xf32> to vector<16x128xf32>
    %109 = arith.addf %107, %108 : vector<16x128xf32>
    %110 = arith.subf %109, %106 : vector<16x128xf32>
    %111 = arith.divf %106, %110 : vector<16x128xf32>
    %112 = vector.broadcast %63 : vector<16x1xf32> to vector<16x128xf32>
    %113 = vector.broadcast %75 : vector<1x128xf32> to vector<16x128xf32>
    %114 = arith.maximumf %112, %113 : vector<16x128xf32>
    %115 = vector.broadcast %60 : vector<16x1xf32> to vector<16x128xf32>
    %116 = vector.broadcast %72 : vector<1x128xf32> to vector<16x128xf32>
    %117 = arith.minimumf %115, %116 : vector<16x128xf32>
    %118 = arith.subf %114, %117 : vector<16x128xf32>
    %cst_25 = arith.constant 0.000000e+00 : f32
    %119 = vector.broadcast %cst_25 : f32 to vector<16x128xf32>
    %120 = arith.maximumf %118, %119 : vector<16x128xf32>
    %121 = vector.broadcast %69 : vector<16x1xf32> to vector<16x128xf32>
    %122 = vector.broadcast %81 : vector<1x128xf32> to vector<16x128xf32>
    %123 = arith.maximumf %121, %122 : vector<16x128xf32>
    %124 = vector.broadcast %66 : vector<16x1xf32> to vector<16x128xf32>
    %125 = vector.broadcast %78 : vector<1x128xf32> to vector<16x128xf32>
    %126 = arith.minimumf %124, %125 : vector<16x128xf32>
    %127 = arith.subf %123, %126 : vector<16x128xf32>
    %cst_26 = arith.constant 0.000000e+00 : f32
    %128 = vector.broadcast %cst_26 : f32 to vector<16x128xf32>
    %129 = arith.maximumf %127, %128 : vector<16x128xf32>
    %130 = arith.mulf %120, %129 : vector<16x128xf32>
    %131 = arith.divf %110, %130 : vector<16x128xf32>
    %cst_27 = arith.constant 1.000000e+00 : f32
    %132 = vector.broadcast %cst_27 : f32 to vector<16x128xf32>
    %133 = arith.subf %132, %131 : vector<16x128xf32>
    %134 = arith.subf %133, %111 : vector<16x128xf32>
    %cst_28 = arith.constant 5.000000e+00 : f32
    %135 = vector.broadcast %cst_28 : f32 to vector<16x128xf32>
    %136 = arith.mulf %135, %57 : vector<16x128xf32>
    %137 = arith.addf %28, %136 : vector<16x128xf32>
    %cst_29 = arith.constant 2.000000e+00 : f32
    %138 = vector.broadcast %cst_29 : f32 to vector<16x128xf32>
    %139 = arith.mulf %138, %134 : vector<16x128xf32>
    %140 = arith.addf %137, %139 : vector<16x128xf32>
    %c0_30 = arith.constant 0 : index
    %c0_31 = arith.constant 0 : index
    %141 = vector.load %arg5[%c0_30, %c0_31] : memref<16x128xf32, #tpu.memory_space<vmem>>, vector<16x128xf32>
    tpu.vector_store %arg5[%c0_30, %c0_31], %140 {strides = array<i32>} : memref<16x128xf32, #tpu.memory_space<vmem>>, vector<16x128xf32>,
    return
  }
  func.func @transform_0(%arg0: i32) -> (i32, i32) {
    %c0_i32 = arith.constant 0 : i32
    %c0_i32_0 = arith.constant 0 : i32
    return %arg0, %c0_i32 : i32, i32
  }
  func.func @transform_1(%arg0: i32) -> (i32, i32) {
    %c0_i32 = arith.constant 0 : i32
    %c0_i32_0 = arith.constant 0 : i32
    return %arg0, %c0_i32 : i32, i32
  }
  func.func @transform_2(%arg0: i32) -> (i32, i32) {
    %c0_i32 = arith.constant 0 : i32
    %c0_i32_0 = arith.constant 0 : i32
    %c0_i32_1 = arith.constant 0 : i32
    return %c0_i32, %c0_i32_0 : i32, i32
  }
  func.func @transform_3(%arg0: i32) -> (i32, i32) {
    %c0_i32 = arith.constant 0 : i32
    %c0_i32_0 = arith.constant 0 : i32
    %c0_i32_1 = arith.constant 0 : i32
    return %c0_i32, %c0_i32_0 : i32, i32
  }
  func.func @transform_4(%arg0: i32) -> (i32, i32) {
    %c0_i32 = arith.constant 0 : i32
    %c0_i32_0 = arith.constant 0 : i32
    return %arg0, %c0_i32 : i32, i32
  }
}

</mosaic_0001>

<bundles_post_ra>
// kernel: tpu_custom_call.1
= control target key start
LH: loop header
LB: loop body
LE: loop exit
PB: predicated region body
PF: predicated region fallthrough
CT: control target
= control target key end

     0   :  { %9 = vsyncpa [#allocation3], 0  ;;  %s670_s0 = inlined_call_operand.vmem [shape: f32[16,32], index: 0, kind: input, shape index: {}]   ;;  %s671_s1 = inlined_call_operand.vmem [shape: f32[16,4], index: 1, kind: input, shape index: {}]   ;;  %s672_s2 = inlined_call_operand.hbm [shape: f32[32,128], index: 2, kind: input, shape index: {}]   ;;  %s673_s3 = inlined_call_operand.vmem [shape: f32[4,128], index: 3, kind: input, shape index: {}]   ;;  %s674_s4 = inlined_call_operand.hbm [shape: f32[16,128], index: 4, kind: output, shape index: {}]  }
   0x1   :  { %10 = vsyncpa [#allocation4], 0  ;;  %s542_s15 = smov [#allocation2]   ;;  %s494_s19 = scalar_lea.hbm %s672_s2, 512 }
   0x2   :  { %s20_s16 = sshll.u32 %s542_s15, 4  ;;  %p495_p0 = scmp.ne.s32.totalorder %s672_s2, %s494_s19  ;;  %s21_s16 = int_to_ptr.vmem [resolvable:$true] %s20_s16 }
   0x3   :  { %p498_p1 = scmp.lt.u32.totalorder %s494_s19, %s672_s2 }
   0x5   :  { %p500_p2 = pnand %p498_p1, %p495_p0 }
   0x7   :  { %503 = shalt.err (!%p500_p2)
}
   0x8   :  { %s504_s24 = scalar_lea.vmem %s21_s16, 512  ;;  %p509_p4 = scmp.lt.s32.totalorder %s21_s16, %s21_s16 }
   0x9   :  { %p505_p3 = scmp.ne.s32.totalorder %s21_s16, %s504_s24  ;;  %p510_p5 = scmp.lt.s32.totalorder %s504_s24, %s504_s24 }
   0xb   :  { %p511_p6 = por %p510_p5, %p509_p4 }
   0xd   :  { %p512_p7 = pnand %p511_p6, %p505_p3 }
   0xf   :  { %515 = shalt.err (!%p512_p7)
}
  0x10   :  { %s543_s25 = smov 128   ;;  %s544_s26 = smov 8  }
  0x11   :  { %26 = dma.hbm_to_vmem [thread:$0]  %s672_s2, 512, %s21_s16, [#allocation3], %s543_s25, %s543_s25, %s544_s26  }
  0x12   :  { %538 = dma.done.wait [#allocation3], 512  }
  0x13   :  { %539 = vsyncadd [#allocation3], 4294966784  ;;  %v545_v0 = vmov 1   ;;  %v546_v1 = vmov 0   ;;  %v597_v2 = vld [vmem:[%s671_s1] sm:$0xff]  ;;  %v602_v3 = vld [vmem:[%s671_s1 + $0x8] sm:$0xff] }
  0x14   :  { %460 = vset.pattern.permute.xlu0 %v545_v0  ;;  %458 = vset.pattern.permute.xlu1 %v546_v1  ;;  %v32_v4 = vld [vmem:[%s670_s0] sm:$0xff]  ;;  %v157_v5 = vmul.f32 0.5, %v597_v2  ;;  %v33_v7 = vld [vmem:[%s670_s0 + $0x8] sm:$0xff]  ;;  %s547_s10 = smov 126   ;;  %v158_v9 = vmul.f32 0.5, %v602_v3  ;;  %v80_v16 = vld [vmem:[#allocation2 + $0x10] sm:$0xff] }
  0x15   :  { %v419_v6 = vmul.f32 -1.442695, %v32_v4  ;;  %v420_v8 = vmul.f32 -1.442695, %v33_v7  ;;  %v78_v14 = vld [vmem:[#allocation2] sm:$0xff]  ;;  %v79_v15 = vld [vmem:[#allocation2 + $0x8] sm:$0xff] }
  0x16   :  { %161 = vrot.lane.b32.xlu0 %v157_v5, %s547_s10  ;;  %v440_v17 = vpack.c.bf16 %v79_v15, %v78_v14  ;;  %v81_v18 = vld [vmem:[#allocation2 + $0x18] sm:$0xff]  ;;  %vm314_vm0 = vcmask 261120   ;;  %s548_s0 = smov 127   ;;  %v550_v7 = vmov 3  }
  0x17   :  { %470 = vpow2.f32 %v419_v6  ;;  %v444_v19 = vpack.c.bf16 %v81_v18, %v80_v16  ;;  %v549_v6 = vmov 2  }
  0x18   :  { %472 = vpow2.f32 %v420_v8  ;;  %441 = vmatprep.subr.bf16.mxu0 %v440_v17 }
  0x19   :  { %443 = vmatpush3.bf16.msra.mxu0 %v440_v17 }
  0x1a   :  { %163 = vrot.lane.b32.xlu0 %v158_v9, %s547_s10  ;;  %445 = vmatprep.subr.bf16.mxu0 %v444_v19 }
  0x1d   :  { %447 = vmatpush3.bf16.msra.mxu0 %v444_v19 }
  0x21   :  { %v471_v10 = vpop.eup %470 }
  0x22   :  { %v473_v11 = vpop.eup %472  ;;  %v40_v12 = vadd.f32 1.0, %v471_v10 }
  0x23   :  { %v41_v13 = vadd.f32 1.0, %v473_v11  ;;  %v638_v11 = vld [vmem:[%s673_s3] sm:$0xf]  ;;  %s551_s3 = smov [#allocation5]  }
  0x24   :  { %474 = vrcp.f32 %v40_v12  ;;  %v95_v12 = vlaneseq  ;;  %s407_s12 = sshll.u32 %s551_s3, 4  ;;  %s408_s12 = int_to_ptr.vmem [resolvable:$true] %s407_s12 }
  0x25   :  { %476 = vrcp.f32 %v41_v13  ;;  %s516_s13 = scalar_lea.vmem %s408_s12, 256  ;;  %p521_p9 = scmp.lt.s32.totalorder %s408_s12, %s408_s12 }
  0x26   :  { %v641_v13 = vshrl.u32 %v95_v12, 7  ;;  %p517_p8 = scmp.ne.s32.totalorder %s408_s12, %s516_s13  ;;  %p522_p10 = scmp.lt.s32.totalorder %s516_s13, %s516_s13 }
  0x28   :  { %v97_v18 = vsub.s32 0, %v641_v13  ;;  %p523_p11 = por %p522_p10, %p521_p9 }
  0x2a   :  { %p524_p12 = pnand %p523_p11, %p517_p8 }
  0x2e   :  { %v475_v20 = vpop.eup %474 }
  0x2f   :  { %v477_v21 = vpop.eup %476  ;;  %v46_v22 = vsub.f32 1.0, %v475_v20  ;;  %v66_v23 = vadd.f32 1e-08, %v475_v20  ;;  %v48_v30 = vmul.f32 %v475_v20, %v475_v20 }
  0x30   :  { %v47_v24 = vsub.f32 1.0, %v477_v21  ;;  %v67_v25 = vadd.f32 1e-08, %v477_v21  ;;  %v49_v32 = vmul.f32 %v477_v21, %v477_v21 }
  0x31   :  { %v52_v26 = vadd.f32 1e-08, %v46_v22  ;;  %478 = vlog2.f32 %v66_v23  ;;  %v62_v28 = vmul.f32 %v46_v22, %v46_v22  ;;  %v50_v40 = vmul.f32 0.75, %v48_v30 }
  0x32   :  { %v53_v27 = vadd.f32 1e-08, %v47_v24  ;;  %480 = vlog2.f32 %v67_v25  ;;  %v63_v29 = vmul.f32 %v47_v24, %v47_v24  ;;  %v51_v43 = vmul.f32 0.75, %v49_v32 }
  0x33   :  { %482 = vlog2.f32 %v52_v26  ;;  %v64_v34 = vmul.f32 0.25, %v62_v28 }
  0x34   :  { %484 = vlog2.f32 %v53_v27  ;;  %v65_v37 = vmul.f32 0.25, %v63_v29 }
  0x3b   :  { %v479_v31 = vpop.eup %478 }
  0x3c   :  { %v481_v33 = vpop.eup %480  ;;  %v69_v35 = vmul.f32 0.6931472, %v479_v31 }
  0x3d   :  { %v483_v36 = vpop.eup %482  ;;  %v71_v38 = vmul.f32 0.6931472, %v481_v33 }
  0x3e   :  { %v485_v39 = vpop.eup %484  ;;  %v55_v41 = vmul.f32 0.6931472, %v483_v36  ;;  %v72_v42 = vsub.f32 0.0, %v69_v35 }
  0x3f   :  { %v57_v44 = vmul.f32 0.6931472, %v485_v39  ;;  %v73_v45 = vsub.f32 0.0, %v71_v38 }
  0x40   :  { %v58_v46 = vsub.f32 0.0, %v55_v41  ;;  %v74_v47 = vmul.f32 %v72_v42, %v64_v34 }
  0x41   :  { %v59_v48 = vsub.f32 0.0, %v57_v44  ;;  %v75_v49 = vmul.f32 %v73_v45, %v65_v37 }
  0x42   :  { %v60_v50 = vmul.f32 %v58_v46, %v50_v40 }
  0x43   :  { %v61_v51 = vmul.f32 %v59_v48, %v51_v43 }
  0x44   :  { %v76_v52 = vsub.f32 %v74_v47, %v60_v50 }
  0x45   :  { %v77_v53 = vsub.f32 %v75_v49, %v61_v51 }
  0x46   :  { %437 = vmatprep.mubr.msk.f32.mxu0 %vm314_vm0, %v76_v52 }
  0x47   :  { %438 = vmatmul.mubr.msk.f32.vlgmr.msra.gmra.mrb[0].mxu0 %vm314_vm0, %v77_v53 }
  0x88   :  { %v162_v54 = vpop.permute.xlu0 %161 }
  0x89   :  { %v167_v55 = vsub.f32 %v597_v2, %v162_v54  ;;  %v169_v56 = vadd.f32 %v162_v54, %v597_v2 }
  0x8b   :  { %v177_v57 = vsub.f32 %v169_v56, %v167_v55 }
  0x8c   :  { %v164_v58 = vpop.permute.xlu0 %163 }
  0x8d   :  { %v168_v59 = vsub.f32 %v602_v3, %v164_v58  ;;  %v170_v60 = vadd.f32 %v164_v58, %v602_v3  ;;  %181 = vrot.lane.b32.xlu1 %v177_v57, %s548_s0 }
  0x8f   :  { %235 = vperm.xlu0 %460, %v170_v60   ;;  %v178_v61 = vsub.f32 %v170_v60, %v168_v59 }
  0x91   :  { %183 = vrot.lane.b32.xlu1 %v178_v61, %s548_s0 }
  0x93   :  { %461 = vset.pattern.permute.xlu0 %v546_v1 }
  0x94   :  { %196 = vperm.xlu0 %461, %v169_v56  }
  0x95   :  { %201 = vperm.xlu1 %458, %v170_v60  }
  0x98   :  { %217 = vperm.xlu0 %461, %v168_v59  }
  0x99   :  { %212 = vperm.xlu1 %458, %v167_v55  }
  0x9c   :  { %92 = vperm.xlu0 %461, %v602_v3  }
  0x9d   :  { %459 = vset.pattern.permute.xlu1 %v545_v0 }
  0x9e   :  { %231 = vperm.xlu1 %459, %v169_v56  }
  0xa2   :  { %245 = vperm.xlu1 %459, %v167_v55  }
  0xa6   :  { %249 = vperm.xlu1 %459, %v168_v59  }
  0xaa   :  { %462 = vset.pattern.permute.xlu1 %v546_v1 }
  0xab   :  { %87 = vperm.xlu1 %462, %v597_v2  }
  0xaf   :  { %463 = vset.pattern.permute.xlu1 %v545_v0 }
  0xb0   :  { %104 = vperm.xlu1 %463, %v597_v2  }
  0xb4   :  { %465 = vset.pattern.permute.xlu1 %v546_v1 }
  0xff   :  { %v182_v62 = vpop.permute.xlu1 %181 }
 0x100   :  { %v187_v63 = vmul.f32 %v182_v62, %v177_v57 }
 0x102   :  { %266 = vperm.xlu0 %461, %v187_v63  }
 0x103   :  { %v184_v4 = vpop.permute.xlu1 %183 }
 0x104   :  { %v188_v5 = vmul.f32 %v184_v4, %v178_v61  ;;  %v98_v4 = vrot.slane %v638_v11, %v97_v18 }
 0x106   :  { %464 = vset.pattern.permute.xlu0 %v545_v0  ;;  %271 = vperm.xlu1 %465, %v188_v5  }
 0x107   :  { %108 = vperm.xlu0 %464, %v602_v3  }
 0x10a   :  { %466 = vset.pattern.permute.xlu1 %v549_v6 }
 0x10b   :  { %122 = vperm.xlu1 %466, %v597_v2   ;;  %467 = vset.pattern.permute.xlu0 %v550_v7 }
 0x10c   :  { %140 = vperm.xlu0 %467, %v597_v2   ;;  %v171_v2 = vmul.f32 0.5, %v638_v11 }
 0x10e   :  { %v173_v14 = vrot.slane %v171_v2, 2  ;;  %v236_v15 = vpop.permute.xlu0 %235 }
 0x10f   :  { %126 = vperm.xlu1 %466, %v602_v3  }
 0x110   :  { %469 = vset.pattern.permute.xlu0 %v546_v1  ;;  %v175_v16 = vsub.f32 %v638_v11, %v173_v14  ;;  %v176_v17 = vadd.f32 %v173_v14, %v638_v11 }
 0x112   :  { %v223_v22 = vrot.slane %v175_v16, %v97_v18  ;;  %v189_v23 = vsub.f32 %v176_v17, %v175_v16  ;;  %v207_v25 = vrot.slane %v176_v17, %v97_v18 }
 0x113   :  { %468 = vset.pattern.permute.xlu1 %v550_v7  ;;  %v197_v21 = vpop.permute.xlu0 %196 }
 0x114   :  { %144 = vperm.xlu1 %468, %v602_v3   ;;  %v202_v9 = vpop.permute.xlu1 %201  ;;  %v113_v3 = vsub.s32 1, %v641_v13  ;;  %v191_v30 = vrot.slane %v189_v23, 1  ;;  %v286_v31 = vmax.f32 %v197_v21, %v207_v25  ;;  %v208_v42 = vmin.f32 %v197_v21, %v207_v25 }
 0x115   :  { %v287_v46 = vmax.f32 %v202_v9, %v207_v25  ;;  %v209_v56 = vmin.f32 %v202_v9, %v207_v25  ;;  %v131_v9 = vsub.s32 2, %v641_v13 }
 0x116   :  { %v255_v19 = vrot.slane %v175_v16, %v113_v3  ;;  %v241_v24 = vrot.slane %v176_v17, %v113_v3  ;;  %v193_v41 = vmul.f32 %v191_v30, %v189_v23  ;;  %v114_v5 = vrot.slane %v638_v11, %v113_v3 }
 0x117   :  { %v218_v32 = vpop.permute.xlu0 %217  ;;  %v149_v16 = vsub.s32 3, %v641_v13 }
 0x118   :  { %v213_v10 = vpop.permute.xlu1 %212  ;;  %v295_v39 = vmax.f32 %v236_v15, %v241_v24  ;;  %v289_v40 = vmin.f32 %v218_v32, %v223_v22  ;;  %v243_v50 = vmin.f32 %v236_v15, %v241_v24  ;;  %v225_v51 = vmax.f32 %v218_v32, %v223_v22 }
 0x119   :  { %v288_v27 = vmin.f32 %v213_v10, %v223_v22  ;;  %v224_v36 = vmax.f32 %v213_v10, %v223_v22  ;;  %v277_v55 = vrot.slane %v193_v41, %v97_v18  ;;  %v132_v22 = vrot.slane %v638_v11, %v131_v9 }
 0x11a   :  { %v631_v8 = vpop.f32.mrb[0].mxu0  ;;  %v291_v54 = vsub.f32 %v287_v46, %v289_v40  ;;  %v227_v61 = vsub.f32 %v209_v56, %v225_v51 }
 0x11b   :  { %v633_v0 = vpop.f32.mrb[1].mxu0  ;;  %v290_v37 = vsub.f32 %v286_v31, %v288_v27  ;;  %v93_v49 = vpop.permute.xlu0 %92  ;;  %v226_v52 = vsub.f32 %v208_v42, %v224_v36 }
 0x11c   :  { %v293_v63 = vmax.f32 %v291_v54, 0.0  ;;  %v229_v14 = vmax.f32 %v227_v61, 0.0 }
 0x11d   :  { %v232_v1 = vpop.permute.xlu1 %231  ;;  %v292_v53 = vmax.f32 %v290_v37, 0.0  ;;  %v228_v62 = vmax.f32 %v226_v52, 0.0 }
 0x11e   :  { %v294_v28 = vmax.f32 %v232_v1, %v241_v24  ;;  %v242_v38 = vmin.f32 %v232_v1, %v241_v24  ;;  %v150_v24 = vrot.slane %v638_v11, %v149_v16 }
 0x121   :  { %v246_v20 = vpop.permute.xlu1 %245 }
 0x122   :  { %v296_v26 = vmin.f32 %v246_v20, %v255_v19  ;;  %v256_v33 = vmax.f32 %v246_v20, %v255_v19 }
 0x124   :  { %v298_v34 = vsub.f32 %v294_v28, %v296_v26  ;;  %v258_v43 = vsub.f32 %v242_v38, %v256_v33 }
 0x125   :  { %v250_v29 = vpop.permute.xlu1 %249 }
 0x126   :  { %v297_v35 = vmin.f32 %v250_v29, %v255_v19  ;;  %v300_v44 = vmax.f32 %v298_v34, 0.0  ;;  %v257_v45 = vmax.f32 %v250_v29, %v255_v19  ;;  %v260_v57 = vmax.f32 %v258_v43, 0.0 }
 0x128   :  { %v299_v47 = vsub.f32 %v295_v39, %v297_v35  ;;  %v302_v58 = vmul.f32 %v300_v44, %v292_v53  ;;  %v259_v59 = vsub.f32 %v243_v50, %v257_v45  ;;  %v262_v12 = vmul.f32 %v260_v57, %v228_v62 }
 0x129   :  { %v100_v35 = vsub.f32 %v93_v49, %v98_v4 }
 0x12a   :  { %v88_v48 = vpop.permute.xlu1 %87  ;;  %v301_v60 = vmax.f32 %v299_v47, 0.0  ;;  %486 = vrcp.f32 %v302_v58  ;;  %v261_v10 = vmax.f32 %v259_v59, 0.0 }
 0x12b   :  { %v99_v17 = vsub.f32 %v88_v48, %v98_v4  ;;  %v102_v45 = vand.u32 2147483647, %v100_v35 }
 0x12c   :  { %v303_v1 = vmul.f32 %v301_v60, %v293_v63  ;;  %v263_v18 = vmul.f32 %v261_v10, %v229_v14 }
 0x12d   :  { %v101_v25 = vand.u32 2147483647, %v99_v17 }
 0x12f   :  { %v105_v6 = vpop.permute.xlu1 %104 }
 0x130   :  { %v115_v19 = vsub.f32 %v105_v6, %v114_v5 }
 0x132   :  { %v117_v26 = vand.u32 2147483647, %v115_v19 }
 0x134   :  { %v487_v13 = vpop.eup %486  ;;  %v119_v32 = vadd.f32 %v117_v26, %v101_v25 }
 0x181   :  { %v267_v7 = vpop.permute.xlu0 %266 }
 0x182   :  { %v278_v2 = vadd.f32 %v277_v55, %v267_v7 }
 0x184   :  { %v280_v15 = vsub.f32 %v278_v2, %v262_v12 }
 0x185   :  { %v272_v20 = vpop.permute.xlu1 %271 }
 0x186   :  { %488 = vrcp.f32 %v280_v15  ;;  %v279_v21 = vadd.f32 %v277_v55, %v272_v20  ;;  %v109_v3 = vpop.permute.xlu0 %108  ;;  %v305_v33 = vmul.f32 %v487_v13, %v280_v15 }
 0x187   :  { %490 = vrcp.f32 %v303_v1  ;;  %v116_v30 = vsub.f32 %v109_v3, %v114_v5 }
 0x188   :  { %v281_v23 = vsub.f32 %v279_v21, %v263_v18  ;;  %v308_v43 = vsub.f32 1.0, %v305_v33 }
 0x189   :  { %v118_v41 = vand.u32 2147483647, %v116_v30 }
 0x18a   :  { %492 = vrcp.f32 %v281_v23  ;;  %v123_v27 = vpop.permute.xlu1 %122 }
 0x18b   :  { %v133_v28 = vsub.f32 %v123_v27, %v132_v22  ;;  %v141_v29 = vpop.permute.xlu0 %140  ;;  %v120_v53 = vadd.f32 %v118_v41, %v102_v45 }
 0x18c   :  { %v151_v31 = vsub.f32 %v141_v29, %v150_v24 }
 0x18d   :  { %v135_v34 = vand.u32 2147483647, %v133_v28 }
 0x18e   :  { %v153_v36 = vand.u32 2147483647, %v151_v31  ;;  %v127_v37 = vpop.permute.xlu1 %126 }
 0x18f   :  { %v137_v38 = vadd.f32 %v135_v34, %v119_v32  ;;  %v134_v39 = vsub.f32 %v127_v37, %v132_v22 }
 0x190   :  { %v489_v40 = vpop.eup %488 }
 0x191   :  { %v491_v11 = vpop.eup %490  ;;  %v283_v42 = vmul.f32 %v489_v40, %v262_v12  ;;  %v155_v44 = vadd.f32 %v153_v36, %v137_v38  ;;  %v136_v47 = vand.u32 2147483647, %v134_v39 }
 0x192   :  { %v307_v46 = vmul.f32 %v491_v11, %v281_v23 }
 0x193   :  { %v145_v48 = vpop.permute.xlu1 %144  ;;  %v310_v50 = vsub.f32 %v308_v43, %v283_v42  ;;  %v312_v51 = vmul.f32 5.0, %v155_v44  ;;  %v138_v58 = vadd.f32 %v136_v47, %v120_v53 }
 0x194   :  { %v493_v52 = vpop.eup %492  ;;  %v152_v54 = vsub.f32 %v145_v48, %v150_v24  ;;  %v309_v57 = vsub.f32 1.0, %v307_v46 }
 0x195   :  { %v285_v49 = vmul.f32 %v493_v52, %v263_v18  ;;  %v388_v55 = vadd.f32 %v633_v0, %v312_v51  ;;  %v396_v56 = vmul.f32 2.0, %v310_v50 }
 0x196   :  { %v154_v59 = vand.u32 2147483647, %v152_v54 }
 0x197   :  { %v398_v60 = vadd.f32 %v396_v56, %v388_v55  ;;  %v311_v62 = vsub.f32 %v309_v57, %v285_v49 }
 0x198   :  { %v156_v61 = vadd.f32 %v154_v59, %v138_v58 }
 0x199   :  { %400 = vst [vmem:[#allocation5] sm:$0xff] %v398_v60  ;;  %v397_v5 = vmul.f32 2.0, %v311_v62 }
 0x19a   :  { %v313_v63 = vmul.f32 5.0, %v156_v61 }
 0x19c   :  { %v393_v4 = vadd.f32 %v631_v8, %v313_v63 }
 0x19e   :  { %v399_v6 = vadd.f32 %v397_v5, %v393_v4 }
 0x1a0   :  { %401 = vst [vmem:[#allocation5 + $0x8] sm:$0xff] %v399_v6 }
 0x1a1   :  { %527 = shalt.err (!%p524_p12)
}
 0x1a2   :  { %s528_s16 = scalar_lea.hbm %s674_s4, 256 }
 0x1a3   :  { %p529_p13 = scmp.ne.s32.totalorder %s674_s4, %s528_s16  ;;  %p532_p0 = scmp.lt.u32.totalorder %s528_s16, %s674_s4 }
 0x1a5   :  { %p534_p1 = pnand %p532_p0, %p529_p13 }
 0x1a7   :  { %537 = shalt.err (!%p534_p1)
}
 0x1a8   :  { %413 = dma.vmem_to_hbm [thread:$0]  %s408_s12, 256, %s674_s4, [#allocation4], %s543_s25, %s543_s25, %s544_s26  }
 0x1a9   :  { %540 = dma.done.wait [#allocation4], 256  }
 0x1aa   :  { %541 = vsyncadd [#allocation4], 4294967040 }
 0x1ab   :  { %417 = vsyncpa [#allocation3], 1 }
 0x1ac   :  { %418 = vsyncpa [#allocation4], 1 }

</bundles_post_ra>
